<compile_context>
chip_gen: v7x
topology: tpu7x:2x2x1
jax: 0.10.0
libtpu: 0.0.40
codegen_flags: <defaults>
</compile_context>

<pallas_src>
import jax
import jax.numpy as jnp
from jax.experimental import pallas as pl
from jax.experimental.pallas import tpu as pltpu

INPUT_DIM = 3
HIDDEN = 100
OUTPUT_DIM = 2
HIDDEN_PAD = 128     # lane-aligned hidden width
OUT_PAD = 128        # lane-dense output slab; real outputs are [:, :OUTPUT_DIM]
TM_MAX = 512         # batch tile: multiple of 256 (v6e/v7x MXU rows), VMEM-safe on v7x


def _round_up(n, m):
    return ((n + m - 1) // m) * m


def _mlp_kernel(t_ref, x_ref, w1_ref, b1_ref, w2_ref, b2_ref, w3_ref, b3_ref, o_ref):
    t = t_ref[...]                      # [TM, 1]   f32
    x = x_ref[...]                      # [TM, 2]   f32
    w1 = w1_ref[...]                    # [3, 128]  f32

    # fc1 on the VPU: K=3 would waste ~98% of a (K padded to 128) MXU pass.
    h1 = (t * w1[0:1, :]
          + x[:, 0:1] * w1[1:2, :]
          + x[:, 1:2] * w1[2:3, :]
          + b1_ref[...])
    h1 = jnp.maximum(h1, 0.0)

    # fc2 on the MXU: bf16 operands, f32 accumulation; bias + ReLU in f32.
    h2 = jnp.dot(h1.astype(jnp.bfloat16), w2_ref[...],
                 preferred_element_type=jnp.float32) + b2_ref[...]
    h2 = jnp.maximum(h2, 0.0)

    # fc_out on the MXU (output lane-padded to 128 -> unmasked vector stores).
    out = jnp.dot(h2.astype(jnp.bfloat16), w3_ref[...],
                  preferred_element_type=jnp.float32) + b3_ref[...]
    o_ref[...] = out.astype(o_ref.dtype)


def net_action_forward(t, x, params, tm=None):
    """t: [B, 1] f32, x: [B, 2] f32 -> [B, 2] f32 (same math as Net_Action.forward)."""
    w1, b1, w2, b2, w3, b3 = params
    B = t.shape[0]
    if tm is None:
        tm = min(TM_MAX, _round_up(max(B, 1), 8))
    b_pad = _round_up(B, tm)
    if b_pad != B:
        t = jnp.pad(t, ((0, b_pad - B), (0, 0)))
        x = jnp.pad(x, ((0, b_pad - B), (0, 0)))

    grid = (b_pad // tm,)

    def batch_spec(f):
        return pl.BlockSpec((tm, f), lambda i: (i, 0))

    def resident(shape):
        return pl.BlockSpec(shape, lambda i: (0, 0))

    out_padded = pl.pallas_call(
        _mlp_kernel,
        out_shape=jax.ShapeDtypeStruct((b_pad, OUT_PAD), jnp.float32),
        grid=grid,
        in_specs=[
            batch_spec(1),          # t   [B_pad, 1]    f32
            batch_spec(2),          # x   [B_pad, 2]    f32
            resident(w1.shape),     # w1  [3, 128]      f32
            resident(b1.shape),     # b1  [1, 128]      f32
            resident(w2.shape),     # w2  [128, 128]    bf16
            resident(b2.shape),     # b2  [1, 128]      f32
            resident(w3.shape),     # w3  [128, 128]    bf16
            resident(b3.shape),     # b3  [1, 128]      f32
        ],
        out_specs=pl.BlockSpec((tm, OUT_PAD), lambda i: (i, 0)),
        compiler_params=pltpu.CompilerParams(
            dimension_semantics=("parallel",)),
    )(t, x, w1, b1, w2, b2, w3, b3)

    return out_padded[:B, :OUTPUT_DIM]


def init_params(key):
    """PyTorch nn.Linear default init (U[-1/sqrt(fan_in), +]), stored transposed
    ([in, out]) and zero-padded to lane-aligned shapes; fc2/fc_out weights in bf16."""
    ks = jax.random.split(key, 6)

    def linear(kw, kb, fan_in, fan_out, pad_in, pad_out, w_dtype):
        bound = 1.0 / float(fan_in) ** 0.5
        w = jax.random.uniform(kw, (fan_in, fan_out), jnp.float32, -bound, bound)
        b = jax.random.uniform(kb, (1, fan_out), jnp.float32, -bound, bound)
        w = jnp.pad(w, ((0, pad_in - fan_in), (0, pad_out - fan_out)))
        b = jnp.pad(b, ((0, 0), (0, pad_out - fan_out)))
        return w.astype(w_dtype), b

    w1, b1 = linear(ks[0], ks[1], INPUT_DIM, HIDDEN, INPUT_DIM, HIDDEN_PAD, jnp.float32)
    w2, b2 = linear(ks[2], ks[3], HIDDEN, HIDDEN, HIDDEN_PAD, HIDDEN_PAD, jnp.bfloat16)
    w3, b3 = linear(ks[4], ks[5], HIDDEN, OUTPUT_DIM, HIDDEN_PAD, OUT_PAD, jnp.bfloat16)
    return (w1, b1, w2, b2, w3, b3)


def reference_forward(t, x, params):
    """Pure-JAX f32 reference with the same (padded) parameters."""
    w1, b1, w2, b2, w3, b3 = params
    tx = jnp.concatenate([t, x], axis=1)                       # [B, 3]
    h1 = jnp.maximum(tx @ w1 + b1, 0.0)
    h2 = jnp.maximum(h1 @ w2.astype(jnp.float32) + b2, 0.0)
    out = h2 @ w3.astype(jnp.float32) + b3
    return out[:, :OUTPUT_DIM]


if __name__ == "__main__":
    key = jax.random.PRNGKey(0)
    kp, kt, kx = jax.random.split(key, 3)

    params = init_params(kp)

    # Small deterministic check (B = 8), shapes consistent with the module.
    B = 8
    t = jax.random.normal(kt, (B, 1), jnp.float32)
    x = jax.random.normal(kx, (B, INPUT_DIM - 1), jnp.float32)
    out = jax.block_until_ready(net_action_forward(t, x, params))
    ref = reference_forward(t, x, params)
    assert out.shape == (B, OUTPUT_DIM), out.shape
    assert jnp.allclose(out, ref, atol=3e-2, rtol=3e-2), "mismatch vs reference (B=8)"

    # Exercise the multi-block grid + padded-batch path (B not a tile multiple).
    B2 = 300
    t2 = jax.random.normal(kt, (B2, 1), jnp.float32)
    x2 = jax.random.normal(kx, (B2, INPUT_DIM - 1), jnp.float32)
    out2 = jax.block_until_ready(net_action_forward(t2, x2, params, tm=128))
    ref2 = reference_forward(t2, x2, params)
    assert out2.shape == (B2, OUTPUT_DIM), out2.shape
    assert jnp.allclose(out2, ref2, atol=3e-2, rtol=3e-2), "mismatch vs reference (B=300)"

    print("KERNEL_OK")
</pallas_src>

<mosaic_0001>
module attributes {stable_mosaic.version = 11 : i64} {
  func.func @_mlp_kernel(%arg0: i32, %arg1: memref<8x1xf32, #tpu.memory_space<vmem>>, %arg2: memref<8x2xf32, #tpu.memory_space<vmem>>, %arg3: memref<3x128xf32, #tpu.memory_space<vmem>>, %arg4: memref<1x128xf32, #tpu.memory_space<vmem>>, %arg5: memref<128x128xbf16, #tpu.memory_space<vmem>>, %arg6: memref<1x128xf32, #tpu.memory_space<vmem>>, %arg7: memref<128x128xbf16, #tpu.memory_space<vmem>>, %arg8: memref<1x128xf32, #tpu.memory_space<vmem>>, %arg9: memref<8x128xf32, #tpu.memory_space<vmem>>) attributes {dimension_semantics = [#tpu.dimension_semantics<parallel>], iteration_bounds = array<i64: 1>, scalar_prefetch = 0 : i64, scratch_operands = 0 : i64, tpu.core_type = #tpu.core_type<tc>, window_params = [{transform_indices = @transform_0, window_bounds = array<i64: 8, 1>}, {transform_indices = @transform_1, window_bounds = array<i64: 8, 2>}, {pipeline_mode = #tpu.pipeline_mode<synchronous>, transform_indices = @transform_2, window_bounds = array<i64: 3, 128>}, {pipeline_mode = #tpu.pipeline_mode<synchronous>, transform_indices = @transform_3, window_bounds = array<i64: 1, 128>}, {pipeline_mode = #tpu.pipeline_mode<synchronous>, transform_indices = @transform_4, window_bounds = array<i64: 128, 128>}, {pipeline_mode = #tpu.pipeline_mode<synchronous>, transform_indices = @transform_5, window_bounds = array<i64: 1, 128>}, {pipeline_mode = #tpu.pipeline_mode<synchronous>, transform_indices = @transform_6, window_bounds = array<i64: 128, 128>}, {pipeline_mode = #tpu.pipeline_mode<synchronous>, transform_indices = @transform_7, window_bounds = array<i64: 1, 128>}, {transform_indices = @transform_8, window_bounds = array<i64: 8, 128>}]} {
    %c0 = arith.constant 0 : index
    %c0_0 = arith.constant 0 : index
    %0 = vector.load %arg1[%c0, %c0_0] : memref<8x1xf32, #tpu.memory_space<vmem>>, vector<8x1xf32>
    %c0_1 = arith.constant 0 : index
    %c0_2 = arith.constant 0 : index
    %1 = vector.load %arg2[%c0_1, %c0_2] : memref<8x2xf32, #tpu.memory_space<vmem>>, vector<8x2xf32>
    %c0_3 = arith.constant 0 : index
    %c0_4 = arith.constant 0 : index
    %2 = vector.load %arg3[%c0_3, %c0_4] : memref<3x128xf32, #tpu.memory_space<vmem>>, vector<3x128xf32>
    %3 = vector.extract_strided_slice %2 {offsets = [0, 0], sizes = [1, 128], strides = [1, 1]} : vector<3x128xf32> to vector<1x128xf32>
    %4 = vector.broadcast %0 : vector<8x1xf32> to vector<8x128xf32>
    %5 = vector.broadcast %3 : vector<1x128xf32> to vector<8x128xf32>
    %6 = arith.mulf %4, %5 : vector<8x128xf32>
    %7 = vector.extract_strided_slice %1 {offsets = [0, 0], sizes = [8, 1], strides = [1, 1]} : vector<8x2xf32> to vector<8x1xf32>
    %8 = vector.extract_strided_slice %2 {offsets = [1, 0], sizes = [1, 128], strides = [1, 1]} : vector<3x128xf32> to vector<1x128xf32>
    %9 = vector.broadcast %7 : vector<8x1xf32> to vector<8x128xf32>
    %10 = vector.broadcast %8 : vector<1x128xf32> to vector<8x128xf32>
    %11 = arith.mulf %9, %10 : vector<8x128xf32>
    %12 = arith.addf %6, %11 : vector<8x128xf32>
    %13 = vector.extract_strided_slice %1 {offsets = [0, 1], sizes = [8, 1], strides = [1, 1]} : vector<8x2xf32> to vector<8x1xf32>
    %14 = vector.extract_strided_slice %2 {offsets = [2, 0], sizes = [1, 128], strides = [1, 1]} : vector<3x128xf32> to vector<1x128xf32>
    %15 = vector.broadcast %13 : vector<8x1xf32> to vector<8x128xf32>
    %16 = vector.broadcast %14 : vector<1x128xf32> to vector<8x128xf32>
    %17 = arith.mulf %15, %16 : vector<8x128xf32>
    %18 = arith.addf %12, %17 : vector<8x128xf32>
    %c0_5 = arith.constant 0 : index
    %c0_6 = arith.constant 0 : index
    %19 = vector.load %arg4[%c0_5, %c0_6] : memref<1x128xf32, #tpu.memory_space<vmem>>, vector<1x128xf32>
    %20 = vector.broadcast %19 : vector<1x128xf32> to vector<8x128xf32>
    %21 = arith.addf %18, %20 : vector<8x128xf32>
    %cst = arith.constant 0.000000e+00 : f32
    %22 = vector.broadcast %cst : f32 to vector<8x128xf32>
    %23 = arith.maximumf %21, %22 : vector<8x128xf32>
    %24 = arith.truncf %23 : vector<8x128xf32> to vector<8x128xbf16>
    %c0_7 = arith.constant 0 : index
    %c0_8 = arith.constant 0 : index
    %25 = vector.load %arg5[%c0_7, %c0_8] : memref<128x128xbf16, #tpu.memory_space<vmem>>, vector<128x128xbf16>
    %cst_9 = arith.constant dense<0.000000e+00> : vector<8x128xf32>
    %26 = tpu.matmul %24, %25, %cst_9 {dimension_numbers = #tpu.dot_dimension_numbers<[1], [0], [0], [1], [0, 0, 1, 1], [], []>} : vector<8x128xbf16>, vector<128x128xbf16>, vector<8x128xf32> -> vector<8x128xf32>
    %c0_10 = arith.constant 0 : index
    %c0_11 = arith.constant 0 : index
    %27 = vector.load %arg6[%c0_10, %c0_11] : memref<1x128xf32, #tpu.memory_space<vmem>>, vector<1x128xf32>
    %28 = vector.broadcast %27 : vector<1x128xf32> to vector<8x128xf32>
    %29 = arith.addf %26, %28 : vector<8x128xf32>
    %cst_12 = arith.constant 0.000000e+00 : f32
    %30 = vector.broadcast %cst_12 : f32 to vector<8x128xf32>
    %31 = arith.maximumf %29, %30 : vector<8x128xf32>
    %32 = arith.truncf %31 : vector<8x128xf32> to vector<8x128xbf16>
    %c0_13 = arith.constant 0 : index
    %c0_14 = arith.constant 0 : index
    %33 = vector.load %arg7[%c0_13, %c0_14] : memref<128x128xbf16, #tpu.memory_space<vmem>>, vector<128x128xbf16>
    %cst_15 = arith.constant dense<0.000000e+00> : vector<8x128xf32>
    %34 = tpu.matmul %32, %33, %cst_15 {dimension_numbers = #tpu.dot_dimension_numbers<[1], [0], [0], [1], [0, 0, 1, 1], [], []>} : vector<8x128xbf16>, vector<128x128xbf16>, vector<8x128xf32> -> vector<8x128xf32>
    %c0_16 = arith.constant 0 : index
    %c0_17 = arith.constant 0 : index
    %35 = vector.load %arg8[%c0_16, %c0_17] : memref<1x128xf32, #tpu.memory_space<vmem>>, vector<1x128xf32>
    %36 = vector.broadcast %35 : vector<1x128xf32> to vector<8x128xf32>
    %37 = arith.addf %34, %36 : vector<8x128xf32>
    %c0_18 = arith.constant 0 : index
    %c0_19 = arith.constant 0 : index
    %38 = vector.load %arg9[%c0_18, %c0_19] : memref<8x128xf32, #tpu.memory_space<vmem>>, vector<8x128xf32>
    tpu.vector_store %arg9[%c0_18, %c0_19], %37 {strides = array<i32>} : memref<8x128xf32, #tpu.memory_space<vmem>>, vector<8x128xf32>,
    return
  }
  func.func @transform_0(%arg0: i32) -> (i32, i32) {
    %c0_i32 = arith.constant 0 : i32
    %c0_i32_0 = arith.constant 0 : i32
    return %arg0, %c0_i32 : i32, i32
  }
  func.func @transform_1(%arg0: i32) -> (i32, i32) {
    %c0_i32 = arith.constant 0 : i32
    %c0_i32_0 = arith.constant 0 : i32
    return %arg0, %c0_i32 : i32, i32
  }
  func.func @transform_2(%arg0: i32) -> (i32, i32) {
    %c0_i32 = arith.constant 0 : i32
    %c0_i32_0 = arith.constant 0 : i32
    %c0_i32_1 = arith.constant 0 : i32
    return %c0_i32, %c0_i32_0 : i32, i32
  }
  func.func @transform_3(%arg0: i32) -> (i32, i32) {
    %c0_i32 = arith.constant 0 : i32
    %c0_i32_0 = arith.constant 0 : i32
    %c0_i32_1 = arith.constant 0 : i32
    return %c0_i32, %c0_i32_0 : i32, i32
  }
  func.func @transform_4(%arg0: i32) -> (i32, i32) {
    %c0_i32 = arith.constant 0 : i32
    %c0_i32_0 = arith.constant 0 : i32
    %c0_i32_1 = arith.constant 0 : i32
    return %c0_i32, %c0_i32_0 : i32, i32
  }
  func.func @transform_5(%arg0: i32) -> (i32, i32) {
    %c0_i32 = arith.constant 0 : i32
    %c0_i32_0 = arith.constant 0 : i32
    %c0_i32_1 = arith.constant 0 : i32
    return %c0_i32, %c0_i32_0 : i32, i32
  }
  func.func @transform_6(%arg0: i32) -> (i32, i32) {
    %c0_i32 = arith.constant 0 : i32
    %c0_i32_0 = arith.constant 0 : i32
    %c0_i32_1 = arith.constant 0 : i32
    return %c0_i32, %c0_i32_0 : i32, i32
  }
  func.func @transform_7(%arg0: i32) -> (i32, i32) {
    %c0_i32 = arith.constant 0 : i32
    %c0_i32_0 = arith.constant 0 : i32
    %c0_i32_1 = arith.constant 0 : i32
    return %c0_i32, %c0_i32_0 : i32, i32
  }
  func.func @transform_8(%arg0: i32) -> (i32, i32) {
    %c0_i32 = arith.constant 0 : i32
    %c0_i32_0 = arith.constant 0 : i32
    return %arg0, %c0_i32 : i32, i32
  }
}

</mosaic_0001>

<bundles_post_ra>
// kernel: tpu_custom_call.1
= control target key start
LH: loop header
LB: loop body
LE: loop exit
PB: predicated region body
PF: predicated region fallthrough
CT: control target
= control target key end

     0   :  { %13 = vsyncpa [#allocation3], 0  ;;  %s647_s0 = inlined_call_operand.vmem [shape: f32[8,1], index: 0, kind: input, shape index: {}]   ;;  %s648_s1 = inlined_call_operand.vmem [shape: f32[8,2], index: 1, kind: input, shape index: {}]   ;;  %s649_s2 = inlined_call_operand.vmem [shape: f32[3,128], index: 2, kind: input, shape index: {}]   ;;  %s650_s3 = inlined_call_operand.vmem [shape: f32[1,128], index: 3, kind: input, shape index: {}]   ;;  %s651_s4 = inlined_call_operand.hbm [shape: bf16[128,128], index: 4, kind: input, shape index: {}]   ;;  %s652_s5 = inlined_call_operand.vmem [shape: f32[1,128], index: 5, kind: input, shape index: {}]   ;;  %s653_s6 = inlined_call_operand.hbm [shape: bf16[128,128], index: 6, kind: input, shape index: {}]   ;;  %s654_s7 = inlined_call_operand.vmem [shape: f32[1,128], index: 7, kind: input, shape index: {}]   ;;  %s655_s8 = inlined_call_operand.hbm [shape: f32[8,128], index: 8, kind: output, shape index: {}]  }
   0x1   :  { %14 = vsyncpa [#allocation6], 0 }
   0x2   :  { %15 = vsyncpa [#allocation4], 0  ;;  %s521_s27 = smov [#allocation2]   ;;  %s449_s9 = scalar_lea.hbm %s651_s4, 1024 }
   0x3   :  { %s29_s28 = sshll.u32 %s521_s27, 4  ;;  %p450_p0 = scmp.ne.s32.totalorder %s651_s4, %s449_s9  ;;  %s30_s28 = int_to_ptr.vmem [resolvable:$true] %s29_s28 }
   0x4   :  { %p453_p1 = scmp.lt.u32.totalorder %s449_s9, %s651_s4 }
   0x6   :  { %p455_p2 = pnand %p453_p1, %p450_p0 }
   0x8   :  { %458 = shalt.err (!%p455_p2)
}
   0x9   :  { %s459_s14 = scalar_lea.vmem %s30_s28, 1024  ;;  %p464_p4 = scmp.lt.s32.totalorder %s30_s28, %s30_s28 }
   0xa   :  { %p460_p3 = scmp.ne.s32.totalorder %s30_s28, %s459_s14  ;;  %p465_p5 = scmp.lt.s32.totalorder %s459_s14, %s459_s14 }
   0xc   :  { %p466_p6 = por %p465_p5, %p464_p4 }
   0xe   :  { %p467_p7 = pnand %p466_p6, %p460_p3 }
  0x10   :  { %470 = shalt.err (!%p467_p7)
}
  0x11   :  { %s522_s15 = smov 64   ;;  %s523_s16 = smov 4  }
  0x12   :  { %35 = dma.hbm_to_vmem [thread:$0]  %s651_s4, 1024, %s30_s28, [#allocation3], %s522_s15, %s522_s15, %s523_s16  }
  0x13   :  { %s524_s19 = smov [#allocation5]   ;;  %s471_s23 = scalar_lea.hbm %s653_s6, 1024 }
  0x14   :  { %s43_s20 = sshll.u32 %s524_s19, 4  ;;  %p472_p8 = scmp.ne.s32.totalorder %s653_s6, %s471_s23  ;;  %s44_s20 = int_to_ptr.vmem [resolvable:$true] %s43_s20 }
  0x15   :  { %p475_p9 = scmp.lt.u32.totalorder %s471_s23, %s653_s6 }
  0x17   :  { %p477_p10 = pnand %p475_p9, %p472_p8 }
  0x19   :  { %480 = shalt.err (!%p477_p10)
}
  0x1a   :  { %s481_s29 = scalar_lea.vmem %s44_s20, 1024  ;;  %p486_p12 = scmp.lt.s32.totalorder %s44_s20, %s44_s20 }
  0x1b   :  { %p482_p11 = scmp.ne.s32.totalorder %s44_s20, %s481_s29  ;;  %p487_p13 = scmp.lt.s32.totalorder %s481_s29, %s481_s29 }
  0x1d   :  { %p488_p0 = por %p487_p13, %p486_p12 }
  0x1f   :  { %p489_p1 = pnand %p488_p0, %p482_p11 }
  0x21   :  { %492 = shalt.err (!%p489_p1)
}
  0x22   :  { %49 = dma.hbm_to_vmem [thread:$0]  %s653_s6, 1024, %s44_s20, [#allocation6], %s522_s15, %s522_s15, %s523_s16  }
  0x23   :  { %515 = dma.done.wait [#allocation3], 1024  }
  0x24   :  { %516 = vsyncadd [#allocation3], 4294966272 }
  0x25   :  { %517 = dma.done.wait [#allocation6], 1024  }
  0x26   :  { %518 = vsyncadd [#allocation6], 4294966272  ;;  %v525_v0 = vmov 0   ;;  %v526_v1 = vmov 1   ;;  %v527_v2 = vmov 0.0   ;;  %v59_v3 = vld [vmem:[%s647_s0] sm:$0xff]  ;;  %v67_v19 = vlaneseq }
  0x27   :  { %430 = vset.pattern.permute.xlu0 %v525_v0  ;;  %431 = vset.pattern.permute.xlu1 %v526_v1  ;;  %v60_v4 = vld [vmem:[%s648_s1] sm:$0xff]  ;;  %v434_v6 = vld [vmem:[#allocation2 + $0x8] sm:$0xff]   ;;  %v435_v7 = vld [vmem:[#allocation2 + $0x10] sm:$0xff]   ;;  %vm528_vm0 = vmmov 0   ;;  %s529_s15 = smov [#allocation7]  }
  0x28   :  { %381 = vmatprep.subr.bf16.mxu0 %v527_v2  ;;  %401 = vmatprep.subr.bf16.mxu1 %v527_v2  ;;  %v433_v5 = vld [vmem:[#allocation2] sm:$0xff]   ;;  %v436_v8 = vld [vmem:[#allocation2 + $0x18] sm:$0xff]   ;;  %v438_v11 = vld [vmem:[#allocation2 + $0x28] sm:$0xff]   ;;  %v68_v20 = vshrl.u32 %v67_v19, 7  ;;  %s334_s16 = sshll.u32 %s529_s15, 4  ;;  %s335_s16 = int_to_ptr.vmem [resolvable:$true] %s334_s16 }
  0x29   :  { %64 = vperm.xlu0 %430, %v59_v3   ;;  %84 = vperm.xlu1 %431, %v60_v4   ;;  %v437_v9 = vld [vmem:[#allocation2 + $0x20] sm:$0xff]   ;;  %v442_v12 = vld [vmem:[#allocation5 + $0x8] sm:$0xff]   ;;  %v439_v13 = vld [vmem:[#allocation2 + $0x30] sm:$0xff]   ;;  %p498_p3 = scmp.lt.s32.totalorder %s335_s16, %s335_s16 }
  0x2a   :  { %382 = vmatpush3.bf16.msra.mxu0 %v433_v5  ;;  %397 = vmatprep.mubr.msk.bf16.mxu0 %vm528_vm0, %v527_v2  ;;  %v441_v10 = vld [vmem:[#allocation5] sm:$0xff]   ;;  %v443_v14 = vld [vmem:[#allocation5 + $0x10] sm:$0xff]   ;;  %v440_v15 = vld [vmem:[#allocation2 + $0x38] sm:$0xff]   ;;  %v69_v21 = vsub.s32 0, %v68_v20  ;;  %v79_v22 = vsub.s32 1, %v68_v20  ;;  %v89_v23 = vsub.s32 2, %v68_v20 }
  0x2b   :  { %383 = vmatprep.subr.bf16.mxu0 %v527_v2  ;;  %417 = vmatprep.mubr.msk.bf16.mxu1 %vm528_vm0, %v527_v2  ;;  %v444_v16 = vld [vmem:[#allocation5 + $0x18] sm:$0xff]   ;;  %v445_v17 = vld [vmem:[#allocation5 + $0x20] sm:$0xff]   ;;  %v446_v18 = vld [vmem:[#allocation5 + $0x28] sm:$0xff]  }
  0x2c   :  { %402 = vmatpush3.bf16.msra.mxu1 %v441_v10  ;;  %v61_v24 = vld [vmem:[%s649_s2] sm:$0x7]  ;;  %v447_v40 = vld [vmem:[#allocation5 + $0x30] sm:$0xff]   ;;  %v448_v41 = vld [vmem:[#allocation5 + $0x38] sm:$0xff]  }
  0x2d   :  { %74 = vperm.xlu0 %430, %v60_v4   ;;  %403 = vmatprep.subr.bf16.mxu1 %v527_v2  ;;  %v70_v26 = vrot.slane %v61_v24, %v69_v21  ;;  %v80_v27 = vrot.slane %v61_v24, %v79_v22  ;;  %v90_v28 = vrot.slane %v61_v24, %v89_v23  ;;  %v344_v35 = vld [vmem:[%s650_s3] ss:$0 sm:$0xff] }
  0x2e   :  { %384 = vmatpush3.bf16.msra.mxu0 %v434_v6  ;;  %v345_v42 = vld [vmem:[%s652_s5] ss:$0 sm:$0xff]  ;;  %s493_s5 = scalar_lea.vmem %s335_s16, 128 }
  0x2f   :  { %385 = vmatprep.subr.bf16.mxu0 %v527_v2  ;;  %v354_v50 = vld [vmem:[%s654_s7] ss:$0 sm:$0xff]  ;;  %p494_p2 = scmp.ne.s32.totalorder %s335_s16, %s493_s5  ;;  %p499_p4 = scmp.lt.s32.totalorder %s493_s5, %s493_s5 }
  0x30   :  { %404 = vmatpush3.bf16.msra.mxu1 %v442_v12 }
  0x31   :  { %432 = vset.pattern.permute.xlu0 %v526_v1  ;;  %405 = vmatprep.subr.bf16.mxu1 %v527_v2  ;;  %p500_p5 = por %p499_p4, %p498_p3 }
  0x32   :  { %386 = vmatpush3.bf16.msra.mxu0 %v435_v7 }
  0x33   :  { %387 = vmatprep.subr.bf16.mxu0 %v527_v2  ;;  %p501_p6 = pnand %p500_p5, %p494_p2 }
  0x34   :  { %406 = vmatpush3.bf16.msra.mxu1 %v443_v14 }
  0x35   :  { %407 = vmatprep.subr.bf16.mxu1 %v527_v2 }
  0x36   :  { %388 = vmatpush3.bf16.msra.mxu0 %v436_v8 }
  0x37   :  { %389 = vmatprep.subr.bf16.mxu0 %v527_v2 }
  0x38   :  { %408 = vmatpush3.bf16.msra.mxu1 %v444_v16 }
  0x39   :  { %409 = vmatprep.subr.bf16.mxu1 %v527_v2 }
  0x3a   :  { %390 = vmatpush3.bf16.msra.mxu0 %v437_v9 }
  0x3b   :  { %391 = vmatprep.subr.bf16.mxu0 %v527_v2 }
  0x3c   :  { %410 = vmatpush3.bf16.msra.mxu1 %v445_v17 }
  0x3d   :  { %411 = vmatprep.subr.bf16.mxu1 %v527_v2 }
  0x3e   :  { %392 = vmatpush3.bf16.msra.mxu0 %v438_v11 }
  0x3f   :  { %393 = vmatprep.subr.bf16.mxu0 %v527_v2 }
  0x40   :  { %412 = vmatpush3.bf16.msra.mxu1 %v446_v18 }
  0x41   :  { %413 = vmatprep.subr.bf16.mxu1 %v527_v2 }
  0x42   :  { %394 = vmatpush3.bf16.msra.mxu0 %v439_v13 }
  0x43   :  { %395 = vmatprep.subr.bf16.mxu0 %v527_v2 }
  0x44   :  { %414 = vmatpush3.bf16.msra.mxu1 %v447_v40 }
  0x45   :  { %415 = vmatprep.subr.bf16.mxu1 %v527_v2 }
  0x46   :  { %396 = vmatpush3.bf16.msra.mxu0 %v440_v15 }
  0x48   :  { %416 = vmatpush3.bf16.msra.mxu1 %v448_v41 }
  0xa8   :  { %v65_v25 = vpop.permute.xlu0 %64  ;;  %v85_v29 = vpop.permute.xlu1 %84 }
  0xa9   :  { %v71_v31 = vmul.f32 %v70_v26, %v65_v25  ;;  %v91_v33 = vmul.f32 %v90_v28, %v85_v29 }
  0xac   :  { %v75_v30 = vpop.permute.xlu0 %74 }
  0xad   :  { %v81_v32 = vmul.f32 %v80_v27, %v75_v30 }
  0xaf   :  { %v82_v34 = vadd.f32 %v81_v32, %v71_v31 }
  0xb1   :  { %v92_v36 = vadd.f32 %v91_v33, %v82_v34 }
  0xb3   :  { %v100_v37 = vadd.f32 %v344_v35, %v92_v36 }
  0xb5   :  { %v101_v38 = vmax.f32 %v100_v37, 0.0 }
  0xb7   :  { %v102_v39 = vpack.c.bf16 %v101_v38, %v101_v38 }
  0xb9   :  { %398 = vmatmul.mubr.bf16.vlgmr.msra.gmra.mrb[0].mxu0 %v102_v39 }
 0x18c   :  { %v208_v43 = vpop.f32.mrb[0].mxu0 }
 0x18d   :  { %v209_v44 = vadd.f32 %v345_v42, %v208_v43  ;;  %v399_v45 = vpop.f32.mrb[1].mxu0 }
 0x18e   :  { %v211_v46 = vpop.f32.mrb[2].mxu0 }
 0x18f   :  { %v214_v47 = vmax.f32 %v209_v44, 0.0  ;;  %v400_v48 = vpop.f32.mrb[3].mxu0 }
 0x191   :  { %v215_v49 = vpack.c.bf16 %v214_v47, %v214_v47 }
 0x193   :  { %418 = vmatmul.mubr.bf16.vlgmr.msra.gmra.mrb[0].mxu1 %v215_v49 }
 0x266   :  { %v321_v51 = vpop.f32.mrb[0].mxu1 }
 0x267   :  { %v322_v52 = vadd.f32 %v354_v50, %v321_v51  ;;  %v419_v53 = vpop.f32.mrb[1].mxu1 }
 0x268   :  { %v324_v54 = vpop.f32.mrb[2].mxu1 }
 0x269   :  { %327 = vst [vmem:[#allocation7] sm:$0xff] %v322_v52  ;;  %v420_v55 = vpop.f32.mrb[3].mxu1 }
 0x26a   :  { %504 = shalt.err (!%p501_p6)
}
 0x26b   :  { %s505_s7 = scalar_lea.hbm %s655_s8, 128 }
 0x26c   :  { %p506_p7 = scmp.ne.s32.totalorder %s655_s8, %s505_s7  ;;  %p509_p8 = scmp.lt.u32.totalorder %s505_s7, %s655_s8 }
 0x26e   :  { %p511_p9 = pnand %p509_p8, %p506_p7 }
 0x270   :  { %514 = shalt.err (!%p511_p9)
}
 0x271   :  { %337 = dma.vmem_to_hbm [thread:$0]  %s335_s16, 128, %s655_s8, [#allocation4]  }
 0x272   :  { %519 = dma.done.wait [#allocation4], 128  }
 0x273   :  { %520 = vsyncadd [#allocation4], 4294967168 }
 0x274   :  { %341 = vsyncpa [#allocation3], 1 }
 0x275   :  { %342 = vsyncpa [#allocation6], 1 }
 0x276   :  { %343 = vsyncpa [#allocation4], 1 }

</bundles_post_ra>
